<compile_context>
chip_gen: v6e
topology: v6e:2x2x1
jax: 0.10.0
libtpu: 0.0.40
codegen_flags: <defaults>
</compile_context>

<pallas_src>
import functools

import jax
import jax.numpy as jnp
from jax.experimental import pallas as pl
from jax.experimental.pallas import tpu as pltpu


# ----------------------------------------------------------------------------
# Fused SGC forward kernel (one graph per grid step):
#   norm -> k-hop aggregation -> hidden linears (+ReLU) -> final linear
# ----------------------------------------------------------------------------
def sgc_fused_kernel(a_ref, x_ref, *rest, k, n_layers):
    # rest = (w_0, b_0, ..., w_{L-1}, b_{L-1}, out)
    o_ref = rest[2 * n_layers]

    a = a_ref[...]                                               # (N, N) f32

    # in_degrees().float().clamp(min=1) ** -0.5, computed in-kernel.
    degs = jnp.maximum(jnp.sum(a, axis=1, keepdims=True), 1.0)   # (N, 1)
    norm = jax.lax.rsqrt(degs)                                   # D^-1/2

    # Pre-normalize A once:  a_hat = D^-1 A  (row scaling only, no transpose).
    # (D^-1/2 A D^-1/2)^k X  ==  D^1/2 (D^-1 A)^k (D^-1/2 X)
    a_hat = a * (norm * norm)                                    # (N, N)

    h = x_ref[...] * norm                                        # D^-1/2 X
    for _ in range(k):                                           # k static -> unrolled
        h = jnp.dot(a_hat, h, preferred_element_type=jnp.float32)
    h = h * (degs * norm)                                        # D^1/2 (...); reuses rsqrt

    # feat_trans: hidden layers (linear + relu), final layer without relu.
    # (bn off, dropout eval no-op, tasks=None -> all-ones mask elided)
    for i in range(n_layers):
        w = rest[2 * i][...]
        b = rest[2 * i + 1][...]
        h = jnp.dot(h, w, preferred_element_type=jnp.float32) + b
        if i < n_layers - 1:
            h = jnp.maximum(h, 0.0)

    o_ref[...] = h                                               # (N, 128) lane-dense


def sgc_forward_batched(a, x, params, k):
    """a: (B, N, N), x: (B, N, D).  Returns ((B, N, n_cls) logits, e_list)."""
    B, N, _ = a.shape
    D = x.shape[-1]
    n_layers = len(params["weights"])
    n_cls = params["weights"][-1].shape[1]

    # Zero-pad the final layer to a 128-multiple so the HBM store is
    # lane-dense (unmasked vst) instead of masked partial stores.
    c_pad = max(128, ((n_cls + 127) // 128) * 128)
    weights = list(params["weights"])
    biases = list(params["biases"])
    h_last = weights[-1].shape[0]
    weights[-1] = jnp.zeros((h_last, c_pad), jnp.float32).at[:, :n_cls].set(
        weights[-1])
    biases[-1] = jnp.zeros((1, c_pad), jnp.float32).at[:, :n_cls].set(
        biases[-1])

    flat = []
    in_specs = [
        pl.BlockSpec((None, N, N), lambda b: (b, 0, 0)),   # per-graph adjacency
        pl.BlockSpec((None, N, D), lambda b: (b, 0, 0)),   # per-graph features
    ]
    for w, bv in zip(weights, biases):
        flat += [w, bv]
        # Shared weights: same block index every grid step -> stays resident.
        in_specs.append(pl.BlockSpec(w.shape, lambda b: (0, 0)))
        in_specs.append(pl.BlockSpec(bv.shape, lambda b: (0, 0)))

    # Advisory cost estimate for XLA's scheduler.
    dims = [D] + [w.shape[1] for w in weights]
    flops_per_graph = 2 * k * N * N * D
    for din, dout in zip(dims[:-1], dims[1:]):
        flops_per_graph += 2 * N * din * dout
    bytes_accessed = 4 * (B * (N * N + N * D + N * c_pad)
                          + sum(w.size + bv.size for w, bv in zip(weights, biases)))
    cost = pl.CostEstimate(flops=B * flops_per_graph,
                           transcendentals=B * N,
                           bytes_accessed=bytes_accessed)

    out = pl.pallas_call(
        functools.partial(sgc_fused_kernel, k=k, n_layers=n_layers),
        out_shape=jax.ShapeDtypeStruct((B, N, c_pad), jnp.float32),
        grid=(B,),
        in_specs=in_specs,
        out_specs=pl.BlockSpec((None, N, c_pad), lambda b: (b, 0, 0)),
        compiler_params=pltpu.CompilerParams(
            dimension_semantics=("parallel",)),   # shards batch over v7x's 2 TCs
        cost_estimate=cost,
    )(a, x, *flat)

    # e_list stays [] because method != 'twp'.
    return out[..., :n_cls], []


def sgc_forward(a, x, params, k):
    """Single-graph forward matching SGC.forward: returns (logits, e_list)."""
    logits, e_list = sgc_forward_batched(a[None], x[None], params, k)
    return logits[0], e_list


# ----------------------------------------------------------------------------
# Params + pure-JAX reference (mirrors the PyTorch module exactly)
# ----------------------------------------------------------------------------
def init_params(key, d_data, h_dims, n_cls):
    dims = [d_data] + list(h_dims) + [n_cls]
    weights, biases = [], []
    for i in range(len(dims) - 1):
        key, kw, kb = jax.random.split(key, 3)
        bound = 1.0 / jnp.sqrt(dims[i])  # PyTorch nn.Linear default init range
        weights.append(jax.random.uniform(
            kw, (dims[i], dims[i + 1]), jnp.float32, -bound, bound))
        biases.append(jax.random.uniform(
            kb, (1, dims[i + 1]), jnp.float32, -bound, bound))
    return {"weights": weights, "biases": biases}


def reference_forward(a, x, params, k):
    degs = jnp.maximum(jnp.sum(a, axis=1), 1.0)
    norm = (degs ** -0.5).reshape(-1, 1)
    h = x
    for _ in range(k):
        h = h * norm
        h = a @ h
        h = h * norm
    for i in range(len(params["weights"]) - 1):
        h = jnp.maximum(h @ params["weights"][i] + params["biases"][i], 0.0)
    return h @ params["weights"][-1] + params["biases"][-1]


if __name__ == "__main__":
    B, N, D_DATA, H_DIM, N_CLS, K = 4, 64, 16, 32, 8, 2

    key = jax.random.PRNGKey(0)
    k_adj, k_x, k_p = jax.random.split(key, 3)

    # Batch of random sparse-ish adjacencies + self-loops (no 0-in-degree node).
    adj = (jax.random.uniform(k_adj, (B, N, N)) < 0.1).astype(jnp.float32)
    adj = jnp.maximum(adj, jnp.eye(N, dtype=jnp.float32)[None])

    x = jax.random.normal(k_x, (B, N, D_DATA), jnp.float32)
    params = init_params(k_p, D_DATA, [H_DIM], N_CLS)

    # Batched path (one pallas_call for all graphs).
    logits_b, e_list = sgc_forward_batched(adj, x, params, K)
    logits_b = jax.block_until_ready(logits_b)
    assert logits_b.shape == (B, N, N_CLS)
    assert e_list == []
    for g in range(B):
        ref = reference_forward(adj[g], x[g], params, K)
        assert jnp.allclose(logits_b[g], ref, atol=1e-4, rtol=1e-4), (
            g, float(jnp.max(jnp.abs(logits_b[g] - ref))))

    # Single-graph path (module-equivalent signature).
    logits_s, e_list_s = sgc_forward(adj[0], x[0], params, K)
    logits_s = jax.block_until_ready(logits_s)
    ref0 = reference_forward(adj[0], x[0], params, K)
    assert logits_s.shape == (N, N_CLS)
    assert e_list_s == []
    assert jnp.allclose(logits_s, ref0, atol=1e-4, rtol=1e-4), (
        float(jnp.max(jnp.abs(logits_s - ref0))))

    print("KERNEL_OK")
</pallas_src>

<mosaic_0001>
module attributes {stable_mosaic.version = 11 : i64} {
  func.func @sgc_fused_kernel(%arg0: i32, %arg1: memref<1x64x64xf32, #tpu.memory_space<vmem>>, %arg2: memref<1x64x16xf32, #tpu.memory_space<vmem>>, %arg3: memref<16x32xf32, #tpu.memory_space<vmem>>, %arg4: memref<1x32xf32, #tpu.memory_space<vmem>>, %arg5: memref<32x128xf32, #tpu.memory_space<vmem>>, %arg6: memref<1x128xf32, #tpu.memory_space<vmem>>, %arg7: memref<1x64x128xf32, #tpu.memory_space<vmem>>) attributes {dimension_semantics = [#tpu.dimension_semantics<parallel>], iteration_bounds = array<i64: 4>, scalar_prefetch = 0 : i64, scratch_operands = 0 : i64, tpu.core_type = #tpu.core_type<tc>, window_params = [{transform_indices = @transform_0, window_bounds = array<i64: 1, 64, 64>}, {transform_indices = @transform_1, window_bounds = array<i64: 1, 64, 16>}, {pipeline_mode = #tpu.pipeline_mode<synchronous>, transform_indices = @transform_2, window_bounds = array<i64: 16, 32>}, {pipeline_mode = #tpu.pipeline_mode<synchronous>, transform_indices = @transform_3, window_bounds = array<i64: 1, 32>}, {pipeline_mode = #tpu.pipeline_mode<synchronous>, transform_indices = @transform_4, window_bounds = array<i64: 32, 128>}, {pipeline_mode = #tpu.pipeline_mode<synchronous>, transform_indices = @transform_5, window_bounds = array<i64: 1, 128>}, {transform_indices = @transform_6, window_bounds = array<i64: 1, 64, 128>}]} {
    %c0 = arith.constant 0 : index
    %c0_0 = arith.constant 0 : index
    %c0_1 = arith.constant 0 : index
    %0 = vector.load %arg1[%c0, %c0_0, %c0_1] : memref<1x64x64xf32, #tpu.memory_space<vmem>>, vector<1x64x64xf32>
    %1 = vector.shape_cast %0 : vector<1x64x64xf32> to vector<64x64xf32>
    %cst = arith.constant dense<0.000000e+00> : vector<64xf32>
    %2 = vector.multi_reduction <add>, %1, %cst [1] : vector<64x64xf32> to vector<64xf32>
    %3 = vector.shape_cast %2 : vector<64xf32> to vector<64x1xf32>
    %cst_2 = arith.constant 1.000000e+00 : f32
    %4 = vector.broadcast %cst_2 : f32 to vector<64x1xf32>
    %5 = arith.maximumf %3, %4 : vector<64x1xf32>
    %6 = math.rsqrt %5 : vector<64x1xf32>
    %7 = arith.mulf %6, %6 : vector<64x1xf32>
    %8 = vector.broadcast %7 : vector<64x1xf32> to vector<64x64xf32>
    %9 = arith.mulf %1, %8 : vector<64x64xf32>
    %c0_3 = arith.constant 0 : index
    %c0_4 = arith.constant 0 : index
    %c0_5 = arith.constant 0 : index
    %10 = vector.load %arg2[%c0_3, %c0_4, %c0_5] : memref<1x64x16xf32, #tpu.memory_space<vmem>>, vector<1x64x16xf32>
    %11 = vector.shape_cast %10 : vector<1x64x16xf32> to vector<64x16xf32>
    %12 = vector.broadcast %6 : vector<64x1xf32> to vector<64x16xf32>
    %13 = arith.mulf %11, %12 : vector<64x16xf32>
    %cst_6 = arith.constant dense<0.000000e+00> : vector<64x16xf32>
    %14 = tpu.matmul %9, %13, %cst_6 {dimension_numbers = #tpu.dot_dimension_numbers<[1], [0], [0], [1], [0, 0, 1, 1], [], []>} : vector<64x64xf32>, vector<64x16xf32>, vector<64x16xf32> -> vector<64x16xf32>
    %cst_7 = arith.constant dense<0.000000e+00> : vector<64x16xf32>
    %15 = tpu.matmul %9, %14, %cst_7 {dimension_numbers = #tpu.dot_dimension_numbers<[1], [0], [0], [1], [0, 0, 1, 1], [], []>} : vector<64x64xf32>, vector<64x16xf32>, vector<64x16xf32> -> vector<64x16xf32>
    %16 = arith.mulf %5, %6 : vector<64x1xf32>
    %17 = vector.broadcast %16 : vector<64x1xf32> to vector<64x16xf32>
    %18 = arith.mulf %15, %17 : vector<64x16xf32>
    %c0_8 = arith.constant 0 : index
    %c0_9 = arith.constant 0 : index
    %19 = vector.load %arg3[%c0_8, %c0_9] : memref<16x32xf32, #tpu.memory_space<vmem>>, vector<16x32xf32>
    %c0_10 = arith.constant 0 : index
    %c0_11 = arith.constant 0 : index
    %20 = vector.load %arg4[%c0_10, %c0_11] : memref<1x32xf32, #tpu.memory_space<vmem>>, vector<1x32xf32>
    %cst_12 = arith.constant dense<0.000000e+00> : vector<64x32xf32>
    %21 = tpu.matmul %18, %19, %cst_12 {dimension_numbers = #tpu.dot_dimension_numbers<[1], [0], [0], [1], [0, 0, 1, 1], [], []>} : vector<64x16xf32>, vector<16x32xf32>, vector<64x32xf32> -> vector<64x32xf32>
    %22 = vector.broadcast %20 : vector<1x32xf32> to vector<64x32xf32>
    %23 = arith.addf %21, %22 : vector<64x32xf32>
    %cst_13 = arith.constant 0.000000e+00 : f32
    %24 = vector.broadcast %cst_13 : f32 to vector<64x32xf32>
    %25 = arith.maximumf %23, %24 : vector<64x32xf32>
    %c0_14 = arith.constant 0 : index
    %c0_15 = arith.constant 0 : index
    %26 = vector.load %arg5[%c0_14, %c0_15] : memref<32x128xf32, #tpu.memory_space<vmem>>, vector<32x128xf32>
    %c0_16 = arith.constant 0 : index
    %c0_17 = arith.constant 0 : index
    %27 = vector.load %arg6[%c0_16, %c0_17] : memref<1x128xf32, #tpu.memory_space<vmem>>, vector<1x128xf32>
    %cst_18 = arith.constant dense<0.000000e+00> : vector<64x128xf32>
    %28 = tpu.matmul %25, %26, %cst_18 {dimension_numbers = #tpu.dot_dimension_numbers<[1], [0], [0], [1], [0, 0, 1, 1], [], []>} : vector<64x32xf32>, vector<32x128xf32>, vector<64x128xf32> -> vector<64x128xf32>
    %29 = vector.broadcast %27 : vector<1x128xf32> to vector<64x128xf32>
    %30 = arith.addf %28, %29 : vector<64x128xf32>
    %c0_19 = arith.constant 0 : index
    %c0_20 = arith.constant 0 : index
    %c0_21 = arith.constant 0 : index
    %31 = vector.load %arg7[%c0_19, %c0_20, %c0_21] : memref<1x64x128xf32, #tpu.memory_space<vmem>>, vector<1x64x128xf32>
    %32 = vector.shape_cast %31 : vector<1x64x128xf32> to vector<64x128xf32>
    %33 = vector.shape_cast %30 : vector<64x128xf32> to vector<1x64x128xf32>
    tpu.vector_store %arg7[%c0_19, %c0_20, %c0_21], %33 {strides = array<i32>} : memref<1x64x128xf32, #tpu.memory_space<vmem>>, vector<1x64x128xf32>,
    return
  }
  func.func @transform_0(%arg0: i32) -> (i32, i32, i32) {
    %c0_i32 = arith.constant 0 : i32
    %c0_i32_0 = arith.constant 0 : i32
    %c0_i32_1 = arith.constant 0 : i32
    return %arg0, %c0_i32, %c0_i32_0 : i32, i32, i32
  }
  func.func @transform_1(%arg0: i32) -> (i32, i32, i32) {
    %c0_i32 = arith.constant 0 : i32
    %c0_i32_0 = arith.constant 0 : i32
    %c0_i32_1 = arith.constant 0 : i32
    return %arg0, %c0_i32, %c0_i32_0 : i32, i32, i32
  }
  func.func @transform_2(%arg0: i32) -> (i32, i32) {
    %c0_i32 = arith.constant 0 : i32
    %c0_i32_0 = arith.constant 0 : i32
    %c0_i32_1 = arith.constant 0 : i32
    return %c0_i32, %c0_i32_0 : i32, i32
  }
  func.func @transform_3(%arg0: i32) -> (i32, i32) {
    %c0_i32 = arith.constant 0 : i32
    %c0_i32_0 = arith.constant 0 : i32
    %c0_i32_1 = arith.constant 0 : i32
    return %c0_i32, %c0_i32_0 : i32, i32
  }
  func.func @transform_4(%arg0: i32) -> (i32, i32) {
    %c0_i32 = arith.constant 0 : i32
    %c0_i32_0 = arith.constant 0 : i32
    %c0_i32_1 = arith.constant 0 : i32
    return %c0_i32, %c0_i32_0 : i32, i32
  }
  func.func @transform_5(%arg0: i32) -> (i32, i32) {
    %c0_i32 = arith.constant 0 : i32
    %c0_i32_0 = arith.constant 0 : i32
    %c0_i32_1 = arith.constant 0 : i32
    return %c0_i32, %c0_i32_0 : i32, i32
  }
  func.func @transform_6(%arg0: i32) -> (i32, i32, i32) {
    %c0_i32 = arith.constant 0 : i32
    %c0_i32_0 = arith.constant 0 : i32
    %c0_i32_1 = arith.constant 0 : i32
    return %arg0, %c0_i32, %c0_i32_0 : i32, i32, i32
  }
}

</mosaic_0001>

<bundles_post_ra>
// kernel: tpu_custom_call.1
= control target key start
LH: loop header
LB: loop body
LE: loop exit
PB: predicated region body
PF: predicated region fallthrough
CT: control target
= control target key end

     0   :  { %11 = vsyncpa [#allocation3], 0  ;;  %s1591_s0 = inlined_call_operand.vmem [shape: f32[4,64,64], index: 0, kind: input, shape index: {}]   ;;  %s1592_s1 = inlined_call_operand.vmem [shape: f32[4,64,16], index: 1, kind: input, shape index: {}]   ;;  %s1593_s2 = inlined_call_operand.vmem [shape: f32[16,32], index: 2, kind: input, shape index: {}]   ;;  %s1594_s3 = inlined_call_operand.vmem [shape: f32[1,32], index: 3, kind: input, shape index: {}]   ;;  %s1595_s4 = inlined_call_operand.vmem [shape: f32[32,128], index: 4, kind: input, shape index: {}]   ;;  %s1596_s5 = inlined_call_operand.vmem [shape: f32[1,128], index: 5, kind: input, shape index: {}]   ;;  %s1597_s6 = inlined_call_operand.hbm [shape: f32[4,64,128], index: 6, kind: output, shape index: {}]  }
   0x1   :  { %13 = vsyncpa [#allocation3 + $0x1], 0  ;;  %s1339_s21 = smov 0   ;;  %s1341_s22 = smov 0  }
   0x2   :  { %s1343_s23 = smov 0   ;;  %s1345_s24 = smov 0  }
   0x3 LB: > { %s1360_s25 = sadd.s32 4294967295, %s1299_s24   ;;  %s985_s26 = sadd.s32 4294967294, %s1299_s24   ;;  %s1299_s24 = sphi %s1345_s24, %s1603_s24   ;;  %s1295_s23 = sphi %s1343_s23, %s1602_s23   ;;  %s1291_s22 = sphi %s1341_s22, %s1601_s22   ;;  %s1287_s21 = sphi %s1339_s21, %s1600_s21  }
   0x4   : > { %s1364_s27 = sadd.s32 1, %s1299_s24   ;;  %s162_s28 = sadd.s32 1, %s1295_s23 }
   0x5   : > { %s159_s29 = ssub.s32 %s1299_s24, %s1364_s27  ;;  %p172_p0 = scmp.ne.s32.totalorder %s1295_s23, %s1291_s22 }
   0x6   : > { %p160_p1 = scmp.eq.s32.totalorder %s159_s29, 0  ;;  %p173_p2 = scmp.eq.s32.totalorder %s1360_s25, 3 }
   0x7   : > { %p178_p3 = scmp.ne.s32.totalorder %s1291_s22, %s1287_s21  ;;  %p179_p4 = scmp.eq.s32.totalorder %s985_s26, 3 }
   0x8   : > { %s1375_s30 = scalar_select %p160_p1, %s1295_s23, %s162_s28  }
   0x9   : > { %p1377_p5 = por %p173_p2, %p172_p0  ;;  %p1381_p6 = por %p179_p4, %p178_p3 }
   0xa   : > { %p988_p7 = scmp.ge.s32.totalorder %s1299_s24, 1  ;;  %p225_p8 = scmp.lt.s32.totalorder %s1299_s24, 5 }
   0xc   : > { %p226_p9 = pnand %p988_p7, %p225_p8 }
   0xd   : > { %p260_p10 = scmp.lt.s32.totalorder (!%p226_p9), %s1360_s25, 3  ;;  %s1035_s26 = sshll.u32 (!%p226_p9), %s1360_s25, 10 }
   0xe   : > { %229 = sbr.rel (%p226_p9) target bundleno = 1041 (0x411), region = 44  ;;  %s1301_s12 = smov (!%p226_p9), [#allocation2]  }
  0x13   : > { %s1389_s9 = scalar_select %p260_p10, %s1360_s25, 3  ;;  %vm278_vm0 = vcmask 523264   ;;  %vm610_vm1 = vcmask 130048   ;;  %vm759_vm2 = vcmask 261120  }
  0x15   : > { %s1033_s10 = sshll.u32 %s1389_s9, 6 }
  0x16   : > { %s264_s13 = scalar_lea.vmem %s1591_s0, %s1033_s10  ;;  %s1434_s16 = scalar_lea.vmem %s1592_s1, %s1033_s10 }
  0x17   : > { %v1397_v0 = vld [vmem:[%s264_s13 + $0x38] sm:$0xff]  ;;  %v1399_v1 = vld [vmem:[%s264_s13 + $0x28] sm:$0xff]  ;;  %v1401_v2 = vld [vmem:[%s264_s13 + $0x30] sm:$0xff]  ;;  %s1545_s10 = scalar_lea.hbm %s1597_s6, %s1035_s26 }
  0x18   : > { %v300_v3 = vsel %vm278_vm0, %v1397_v0, 0.0  ;;  %v294_v4 = vsel %vm278_vm0, %v1399_v1, 0.0  ;;  %v1407_v5 = vld [vmem:[%s264_s13 + $0x20] sm:$0xff]  ;;  %v297_v6 = vsel %vm278_vm0, %v1401_v2, 0.0  ;;  %v1413_v8 = vld [vmem:[%s264_s13 + $0x18] sm:$0xff]  ;;  %v1415_v9 = vld [vmem:[%s264_s13 + $0x10] sm:$0xff] }
  0x19   : > { %301 = vadd.xlane.f32.xlu0 %v300_v3  ;;  %295 = vadd.xlane.f32.xlu1 %v294_v4  ;;  %v291_v7 = vsel %vm278_vm0, %v1407_v5, 0.0  ;;  %v288_v10 = vsel %vm278_vm0, %v1413_v8, 0.0  ;;  %v285_v11 = vsel %vm278_vm0, %v1415_v9, 0.0  ;;  %v1421_v12 = vld [vmem:[%s264_s13 + $0x8] sm:$0xff]  ;;  %v1423_v13 = vld [vmem:[%s264_s13] sm:$0xff]  ;;  %v342_v32 = vld [vmem:[%s1434_s16 + $0x38] sm:$0xff] }
  0x1a   : > { %v282_v14 = vsel %vm278_vm0, %v1421_v12, 0.0  ;;  %v279_v15 = vsel %vm278_vm0, %v1423_v13, 0.0  ;;  %v341_v37 = vld [vmem:[%s1434_s16 + $0x30] sm:$0xff]  ;;  %v340_v40 = vld [vmem:[%s1434_s16 + $0x28] sm:$0xff]  ;;  %v339_v41 = vld [vmem:[%s1434_s16 + $0x20] sm:$0xff]  ;;  %s1243_s13 = sshll.u32 %s1301_s12, 4  ;;  %s1244_s13 = int_to_ptr.vmem [resolvable:$false] %s1243_s13 }
  0x1b   : > { %v338_v45 = vld [vmem:[%s1434_s16 + $0x18] sm:$0xff]  ;;  %v337_v50 = vld [vmem:[%s1434_s16 + $0x10] sm:$0xff]  ;;  %v336_v54 = vld [vmem:[%s1434_s16 + $0x8] sm:$0xff]  ;;  %s1245_s14 = scalar_lea.vmem %s1244_s13, 2048 }
  0x1c   : > { %v335_v58 = vld [vmem:[%s1434_s16] sm:$0xff]  ;;  %s257_s16 = sand.u32 1, %s1291_s22  }
  0x1d   : > { %298 = vadd.xlane.f32.xlu0 %v297_v6  ;;  %292 = vadd.xlane.f32.xlu1 %v291_v7  ;;  %s989_s17 = sshll.u32 %s257_s16, 6  ;;  %s1551_s25 = scalar_lea.sflag [#allocation3], %s257_s16 }
  0x1e   : > { %s259_s20 = scalar_lea.vmem [#allocation2], %s989_s17 }
  0x1f   : > { %s911_s28 = sshll.u32 %s259_s20, 4  ;;  %s1547_s28 = int_to_ptr.vmem [resolvable:$true] %s911_s28 }
  0x20   : > { %s1239_s11 = scalar_lea.vmem %s1547_s28, 1024  ;;  %p1246_p0 = scmp.lt.s32.totalorder %s1547_s28, %s1244_s13 }
  0x21   : > { %289 = vadd.xlane.f32.xlu0 %v288_v10  ;;  %286 = vadd.xlane.f32.xlu1 %v285_v11  ;;  %p1240_p11 = scmp.ne.s32.totalorder %s1547_s28, %s1239_s11  ;;  %p1247_p1 = scmp.lt.s32.totalorder %s1245_s14, %s1239_s11 }
  0x23   : > { %p1241_p12 = pnand %p1240_p11, %p1377_p5  ;;  %p1248_p2 = por %p1247_p1, %p1246_p0 }
  0x25   : > { %283 = vadd.xlane.f32.xlu0 %v282_v14  ;;  %280 = vadd.xlane.f32.xlu1 %v279_v15  ;;  %p1242_p13 = pneg %p1241_p12 }
  0x27   : > { %p1249_p3 = pnand %p1248_p2, %p1242_p13 }
  0xa2   : > { %v302_v16 = vpop.xlane.xlu0 %301  ;;  %v296_v17 = vpop.xlane.xlu1 %295 }
  0xa3   : > { %v310_v18 = vmax.f32 %v302_v16, 1.0  ;;  %v308_v19 = vmax.f32 %v296_v17, 1.0 }
  0xa5   : > { %1223 = vrsqrt.f32 %v310_v18 }
  0xa6   : > { %1225 = vrsqrt.f32 %v308_v19  ;;  %v299_v20 = vpop.xlane.xlu0 %298  ;;  %v293_v21 = vpop.xlane.xlu1 %292 }
  0xa7   : > { %v309_v22 = vmax.f32 %v299_v20, 1.0  ;;  %v307_v23 = vmax.f32 %v293_v21, 1.0 }
  0xa9   : > { %1227 = vrsqrt.f32 %v309_v22 }
  0xaa   : > { %1229 = vrsqrt.f32 %v307_v23  ;;  %v290_v24 = vpop.xlane.xlu0 %289  ;;  %v287_v25 = vpop.xlane.xlu1 %286 }
  0xab   : > { %v306_v26 = vmax.f32 %v290_v24, 1.0  ;;  %v305_v27 = vmax.f32 %v287_v25, 1.0 }
  0xad   : > { %1231 = vrsqrt.f32 %v306_v26 }
  0xae   : > { %1233 = vrsqrt.f32 %v305_v27  ;;  %v284_v28 = vpop.xlane.xlu0 %283  ;;  %v281_v29 = vpop.xlane.xlu1 %280 }
  0xaf   : > { %v304_v30 = vmax.f32 %v284_v28, 1.0  ;;  %v303_v31 = vmax.f32 %v281_v29, 1.0  ;;  %v749_v28 = vld [vmem:[%s1595_s4 + $0x8] sm:$0xff] }
  0xb1   : > { %1235 = vrsqrt.f32 %v304_v30 }
  0xb2   : > { %v1437_v33 = vpop.eup %1223  ;;  %1237 = vrsqrt.f32 %v303_v31 }
  0xb3   : > { %v1226_v34 = vpop.eup %1225  ;;  %v350_v35 = vmul.f32 %v1437_v33, %v342_v32  ;;  %v1441_v36 = vmul.f32 %v1437_v33, %v310_v18 }
  0xb4   : > { %v1444_v38 = vmul.f32 %v1226_v34, %v308_v19  ;;  %v348_v47 = vmul.f32 %v1226_v34, %v340_v40  ;;  %v324_v16 = vmul.f32 %v1226_v34, %v1226_v34 }
  0xb5   : > { %1090 = vmatprep.subr.mxu0 %v350_v35 }
  0xb6   : > { %v1228_v39 = vpop.eup %1227  ;;  %1091 = vmatpush3.msra.mxu0 %v350_v35 }
  0xb7   : > { %v1230_v42 = vpop.eup %1229  ;;  %v349_v43 = vmul.f32 %v1228_v39, %v341_v37  ;;  %v1448_v44 = vmul.f32 %v1228_v39, %v309_v22  ;;  %v325_v18 = vmul.f32 %v1228_v39, %v1228_v39 }
  0xb8   : > { %v1451_v46 = vmul.f32 %v1230_v42, %v307_v23  ;;  %v347_v48 = vmul.f32 %v1230_v42, %v339_v41  ;;  %v323_v15 = vmul.f32 %v1230_v42, %v1230_v42 }
  0xb9   : > { %1092 = vmatprep.subr.mxu0 %v349_v43  ;;  %v333_v19 = vmul.f32 %v325_v18, %v1401_v2 }
  0xba   : > { %v1232_v49 = vpop.eup %1231  ;;  %1093 = vmatpush3.msra.mxu0 %v349_v43  ;;  %v331_v17 = vmul.f32 %v323_v15, %v1407_v5  ;;  %v602_v5 = vld [vmem:[%s1593_s2 + $0x8] sm:$0xff]  ;;  %v1019_v15 = vld [vmem:[%s1596_s5] ss:$0 sm:$0xff] }
  0xbb   : > { %v1234_v51 = vpop.eup %1233  ;;  %1094 = vmatprep.subr.mxu0 %v348_v47  ;;  %v346_v52 = vmul.f32 %v1232_v49, %v338_v45  ;;  %v1454_v53 = vmul.f32 %v1232_v49, %v306_v26  ;;  %v322_v11 = vmul.f32 %v1232_v49, %v1232_v49  ;;  %v751_v26 = vld [vmem:[%s1595_s4 + $0x18] sm:$0xff] }
  0xbc   : > { %1095 = vmatpush3.msra.mxu0 %v348_v47  ;;  %v1457_v55 = vmul.f32 %v1234_v51, %v305_v27  ;;  %v345_v56 = vmul.f32 %v1234_v51, %v337_v50  ;;  %v321_v7 = vmul.f32 %v1234_v51, %v1234_v51  ;;  %v750_v27 = vld [vmem:[%s1595_s4 + $0x10] sm:$0xff] }
  0xbd   : > { %1096 = vmatprep.subr.mxu0 %v347_v48 }
  0xbe   : > { %v1236_v57 = vpop.eup %1235  ;;  %1097 = vmatpush3.msra.mxu0 %v347_v48  ;;  %v329_v14 = vmul.f32 %v321_v7, %v1415_v9  ;;  %v326_v9 = vmul.f32 %v1437_v33, %v1437_v33 }
  0xbf   : > { %v1238_v59 = vpop.eup %1237  ;;  %v1460_v60 = vmul.f32 %v1236_v57, %v304_v30  ;;  %1098 = vmatprep.subr.mxu0 %v346_v52  ;;  %v344_v61 = vmul.f32 %v1236_v57, %v336_v54  ;;  %v320_v4 = vmul.f32 %v1236_v57, %v1236_v57 }
  0xc0   : > { %v1462_v62 = vmul.f32 %v1238_v59, %v303_v31  ;;  %1099 = vmatpush3.msra.mxu0 %v346_v52  ;;  %v319_v63 = vmul.f32 %v1238_v59, %v1238_v59  ;;  %v343_v3 = vmul.f32 %v1238_v59, %v335_v58 }
  0xc1   : > { %1100 = vmatprep.subr.mxu0 %v345_v56  ;;  %v328_v10 = vmul.f32 %v320_v4, %v1421_v12  ;;  %v332_v12 = vmul.f32 %v324_v16, %v1399_v1  ;;  %v601_v1 = vld [vmem:[%s1593_s2] sm:$0xff] }
  0xc2   : > { %1101 = vmatpush3.msra.mxu0 %v345_v56  ;;  %v327_v6 = vmul.f32 %v319_v63, %v1423_v13  ;;  %v330_v13 = vmul.f32 %v322_v11, %v1413_v8  ;;  %v334_v8 = vmul.f32 %v326_v9, %v1397_v0 }
  0xc3   : > { %1102 = vmatprep.subr.mxu0 %v344_v61 }
  0xc4   : > { %1103 = vmatpush3.msra.mxu0 %v344_v61  ;;  %1106 = vmatprep.mubr.msk.f32.mxu0 %vm278_vm0, %v327_v6 }
  0xc5   : > { %1104 = vmatprep.subr.mxu0 %v343_v3  ;;  %1134 = vmatprep.mubr.msk.f32.mxu1 %vm278_vm0, %v327_v6 }
  0xc6   : > { %1105 = vmatpush3.msra.mxu0 %v343_v3 }
  0xc7   : > { %1107 = vmatmul.mubr.msk.f32.vlgmr.msra.gmra.mxu0 %vm278_vm0, %v328_v10  ;;  %1146 = vmatprep.subr.mxu0 %v602_v5 }
  0xc8   : > { %1109 = vmatprep.mubr.msk.f32.mxu0 %vm278_vm0, %v329_v14  ;;  %1147 = vmatpush3.msra.mxu0 %v602_v5 }
  0xc9   : > { %1148 = vmatprep.subr.mxu0 %v601_v1 }
  0xca   : > { %1149 = vmatpush3.msra.mxu0 %v601_v1 }
  0xcb   : > { %1110 = vmatmul.mubr.msk.f32.gmra.mxu0 %vm278_vm0, %v330_v13 }
  0xcc   : > { %1112 = vmatprep.mubr.msk.f32.mxu0 %vm278_vm0, %v331_v17 }
  0xcf   : > { %1113 = vmatmul.mubr.msk.f32.gmra.mxu0 %vm278_vm0, %v332_v12 }
  0xd0   : > { %1115 = vmatprep.mubr.msk.f32.mxu0 %vm278_vm0, %v333_v19 }
  0xd3   : > { %1116 = vmatmul.mubr.msk.f32.gmra.mxu0 %vm278_vm0, %v334_v8 }
 0x187   : > { %v1108_v2 = vpop.f32.mrf.mxu0 }
 0x189   : > { %v441_v20 = vpop.f32.mrf.mxu0 }
 0x18b   : > { %v1111_v21 = vpop.f32.mrf.mxu0 }
 0x18d   : > { %v451_v22 = vpop.f32.mrf.mxu0 }
 0x18f   : > { %v1114_v23 = vpop.f32.mrf.mxu0 }
 0x191   : > { %v461_v0 = vpop.f32.mrf.mxu0 }
 0x193   : > { %v1117_v24 = vpop.f32.mrf.mxu0 }
 0x194   : > { %1118 = vmatprep.subr.mxu1 %v1117_v24 }
 0x195   : > { %v471_v25 = vpop.f32.mrf.mxu0  ;;  %1119 = vmatpush3.msra.mxu1 %v1117_v24 }
 0x196   : > { %1120 = vmatprep.subr.mxu1 %v471_v25 }
 0x197   : > { %1121 = vmatpush3.msra.mxu1 %v471_v25 }
 0x198   : > { %1122 = vmatprep.subr.mxu1 %v1114_v23 }
 0x199   : > { %1123 = vmatpush3.msra.mxu1 %v1114_v23 }
 0x19a   : > { %1124 = vmatprep.subr.mxu1 %v461_v0 }
 0x19b   : > { %1125 = vmatpush3.msra.mxu1 %v461_v0 }
 0x19c   : > { %1126 = vmatprep.subr.mxu1 %v1111_v21 }
 0x19d   : > { %1127 = vmatpush3.msra.mxu1 %v1111_v21 }
 0x19e   : > { %1128 = vmatprep.subr.mxu1 %v451_v22 }
 0x19f   : > { %1129 = vmatpush3.msra.mxu1 %v451_v22 }
 0x1a0   : > { %1130 = vmatprep.subr.mxu1 %v1108_v2 }
 0x1a1   : > { %1131 = vmatpush3.msra.mxu1 %v1108_v2 }
 0x1a2   : > { %1132 = vmatprep.subr.mxu1 %v441_v20 }
 0x1a3   : > { %1133 = vmatpush3.msra.mxu1 %v441_v20 }
 0x1a4   : > { %1135 = vmatmul.mubr.msk.f32.vlgmr.msra.gmra.mxu1 %vm278_vm0, %v328_v10  ;;  %1162 = vmatprep.subr.mxu1 %v751_v26 }
 0x1a5   : > { %1137 = vmatprep.mubr.msk.f32.mxu1 %vm278_vm0, %v329_v14  ;;  %1163 = vmatpush3.msra.mxu1 %v751_v26 }
 0x1a6   : > { %1164 = vmatprep.subr.mxu1 %v750_v27 }
 0x1a7   : > { %1165 = vmatpush3.msra.mxu1 %v750_v27 }
 0x1a8   : > { %1138 = vmatmul.mubr.msk.f32.gmra.mxu1 %vm278_vm0, %v330_v13  ;;  %1166 = vmatprep.subr.mxu1 %v749_v28 }
 0x1a9   : > { %1140 = vmatprep.mubr.msk.f32.mxu1 %vm278_vm0, %v331_v17  ;;  %1167 = vmatpush3.msra.mxu1 %v749_v28 }
 0x1ac   : > { %1141 = vmatmul.mubr.msk.f32.gmra.mxu1 %vm278_vm0, %v332_v12 }
 0x1ad   : > { %1143 = vmatprep.mubr.msk.f32.mxu1 %vm278_vm0, %v333_v19 }
 0x1b0   : > { %1144 = vmatmul.mubr.msk.f32.gmra.mxu1 %vm278_vm0, %v334_v8 }
 0x264   : > { %v1136_v29 = vpop.f32.mrf.mxu1 }
 0x265   : > { %v594_v32 = vmul.f32 %v1136_v29, %v1460_v60 }
 0x266   : > { %v546_v30 = vpop.f32.mrf.mxu1 }
 0x267   : > { %v593_v31 = vmul.f32 %v1462_v62, %v546_v30 }
 0x268   : > { %v1139_v33 = vpop.f32.mrf.mxu1 }
 0x269   : > { %1150 = vmatprep.mubr.msk.f32.mxu0 %vm610_vm1, %v593_v31  ;;  %v596_v37 = vmul.f32 %v1139_v33, %v1454_v53 }
 0x26a   : > { %v556_v34 = vpop.f32.mrf.mxu1  ;;  %1151 = vmatmul.mubr.msk.f32.vlgmr.msra.gmra.mxu0 %vm610_vm1, %v594_v32 }
 0x26b   : > { %v595_v35 = vmul.f32 %v1457_v55, %v556_v34 }
 0x26c   : > { %v1142_v39 = vpop.f32.mrf.mxu1 }
 0x26d   : > { %1153 = vmatprep.mubr.msk.f32.mxu0 %vm610_vm1, %v595_v35  ;;  %v598_v42 = vmul.f32 %v1142_v39, %v1444_v38  ;;  %v1010_v38 = vld [vmem:[%s1594_s3] ss:$0 sm:$0xff] }
 0x26e   : > { %v566_v40 = vpop.f32.mrf.mxu1  ;;  %1154 = vmatmul.mubr.msk.f32.gmra.mxu0 %vm610_vm1, %v596_v37 }
 0x26f   : > { %v597_v41 = vmul.f32 %v1451_v46, %v566_v40  ;;  %v748_v46 = vld [vmem:[%s1595_s4] sm:$0xff] }
 0x270   : > { %v1145_v43 = vpop.f32.mrf.mxu1  ;;  %1168 = vmatprep.subr.mxu1 %v748_v46 }
 0x271   : > { %1156 = vmatprep.mubr.msk.f32.mxu0 %vm610_vm1, %v597_v41  ;;  %v600_v48 = vmul.f32 %v1145_v43, %v1441_v36  ;;  %1169 = vmatpush3.msra.mxu1 %v748_v46 }
 0x272   : > { %v576_v45 = vpop.f32.mrf.mxu1  ;;  %1157 = vmatmul.mubr.msk.f32.gmra.mxu0 %vm610_vm1, %v598_v42 }
 0x273   : > { %v599_v47 = vmul.f32 %v1448_v44, %v576_v45 }
 0x275   : > { %1159 = vmatprep.mubr.msk.f32.mxu0 %vm610_vm1, %v599_v47 }
 0x276   : > { %1160 = vmatmul.mubr.msk.f32.gmra.mxu0 %vm610_vm1, %v600_v48 }
 0x32a   : > { %v1152_v49 = vpop.f32.mrf.mxu0 }
 0x32b   : > { %v707_v50 = vadd.f32 %v1152_v49, %v1010_v38 }
 0x32c   : > { %v701_v51 = vpop.f32.mrf.mxu0 }
 0x32d   : > { %v702_v44 = vadd.f32 %v1010_v38, %v701_v51  ;;  %v741_v53 = vmax.f32 %v707_v50, 0.0 }
 0x32e   : > { %v1155_v52 = vpop.f32.mrf.mxu0 }
 0x32f   : > { %v740_v36 = vmax.f32 %v702_v44, 0.0  ;;  %v717_v54 = vadd.f32 %v1155_v52, %v1010_v38 }
 0x330   : > { %v711_v55 = vpop.f32.mrf.mxu0 }
 0x331   : > { %v712_v56 = vadd.f32 %v1010_v38, %v711_v55  ;;  %1170 = vmatprep.mubr.msk.f32.mxu1 %vm759_vm2, %v740_v36  ;;  %v743_v59 = vmax.f32 %v717_v54, 0.0 }
 0x332   : > { %v1158_v57 = vpop.f32.mrf.mxu0  ;;  %1171 = vmatmul.mubr.msk.f32.vlgmr.msra.gmra.mxu1 %vm759_vm2, %v741_v53 }
 0x333   : > { %v742_v58 = vmax.f32 %v712_v56, 0.0  ;;  %v727_v60 = vadd.f32 %v1158_v57, %v1010_v38 }
 0x334   : > { %v721_v61 = vpop.f32.mrf.mxu0 }
 0x335   : > { %v722_v62 = vadd.f32 %v1010_v38, %v721_v61  ;;  %1173 = vmatprep.mubr.msk.f32.mxu1 %vm759_vm2, %v742_v58  ;;  %v745_v4 = vmax.f32 %v727_v60, 0.0 }
 0x336   : > { %v1161_v63 = vpop.f32.mrf.mxu0  ;;  %1174 = vmatmul.mubr.msk.f32.gmra.mxu1 %vm759_vm2, %v743_v59 }
 0x337   : > { %v744_v3 = vmax.f32 %v722_v62, 0.0  ;;  %v737_v6 = vadd.f32 %v1161_v63, %v1010_v38 }
 0x338   : > { %v731_v7 = vpop.f32.mrf.mxu0 }
 0x339   : > { %v732_v10 = vadd.f32 %v1010_v38, %v731_v7  ;;  %1176 = vmatprep.mubr.msk.f32.mxu1 %vm759_vm2, %v744_v3  ;;  %v747_v14 = vmax.f32 %v737_v6, 0.0 }
 0x33a   : > { %1177 = vmatmul.mubr.msk.f32.gmra.mxu1 %vm759_vm2, %v745_v4 }
 0x33b   : > { %v746_v11 = vmax.f32 %v732_v10, 0.0 }
 0x33d   : > { %1179 = vmatprep.mubr.msk.f32.mxu1 %vm759_vm2, %v746_v11 }
 0x33e   : > { %1180 = vmatmul.mubr.msk.f32.gmra.mxu1 %vm759_vm2, %v747_v14 }
 0x3f2   : > { %v1172_v13 = vpop.f32.mrf.mxu1 }
 0x3f3   : > { %v856_v16 = vadd.f32 %v1172_v13, %v1019_v15 }
 0x3f4   : > { %v850_v17 = vpop.f32.mrf.mxu1 }
 0x3f5   : > { %890 = vst [vmem:[%s259_s20 + $0x8] sm:$0xff] %v856_v16  ;;  %v851_v18 = vadd.f32 %v1019_v15, %v850_v17 }
 0x3f6   : > { %v1175_v12 = vpop.f32.mrf.mxu1 }
 0x3f7   : > { %889 = vst [vmem:[%s259_s20] sm:$0xff] %v851_v18  ;;  %v866_v9 = vadd.f32 %v1175_v12, %v1019_v15 }
 0x3f8   : > { %v860_v19 = vpop.f32.mrf.mxu1 }
 0x3f9   : > { %892 = vst [vmem:[%s259_s20 + $0x18] sm:$0xff] %v866_v9  ;;  %v861_v8 = vadd.f32 %v1019_v15, %v860_v19 }
 0x3fa   : > { %v1178_v5 = vpop.f32.mrf.mxu1 }
 0x3fb   : > { %891 = vst [vmem:[%s259_s20 + $0x10] sm:$0xff] %v861_v8  ;;  %v876_v1 = vadd.f32 %v1178_v5, %v1019_v15 }
 0x3fc   : > { %v870_v2 = vpop.f32.mrf.mxu1 }
 0x3fd   : > { %894 = vst [vmem:[%s259_s20 + $0x28] sm:$0xff] %v876_v1  ;;  %v871_v20 = vadd.f32 %v1019_v15, %v870_v2 }
 0x3fe   : > { %v1181_v21 = vpop.f32.mrf.mxu1 }
 0x3ff   : > { %893 = vst [vmem:[%s259_s20 + $0x20] sm:$0xff] %v871_v20  ;;  %v886_v22 = vadd.f32 %v1181_v21, %v1019_v15 }
 0x400   : > { %v880_v23 = vpop.f32.mrf.mxu1 }
 0x401   : > { %896 = vst [vmem:[%s259_s20 + $0x38] sm:$0xff] %v886_v22  ;;  %v881_v0 = vadd.f32 %v1019_v15, %v880_v23 }
 0x403   : > { %895 = vst [vmem:[%s259_s20 + $0x30] sm:$0xff] %v881_v0 }
 0x404   : > { %1252 = shalt.err (!%p1249_p3)
}
 0x405   : > { %s1253_s15 = scalar_lea.hbm %s1545_s10, 1024  ;;  %s1257_s18 = scalar_lea.hbm %s1597_s6, 4096 }
 0x406   : > { %p1254_p4 = scmp.ne.s32.totalorder %s1545_s10, %s1253_s15  ;;  %p1258_p9 = scmp.lt.s32.totalorder %s1545_s10, %s1597_s6 }
 0x407   : > { %p1259_p10 = scmp.lt.s32.totalorder %s1257_s18, %s1253_s15 }
 0x408   : > { %p1255_p7 = pnand %p1254_p4, %p1377_p5 }
 0x409   : > { %p1260_p11 = por %p1259_p10, %p1258_p9 }
 0x40a   : > { %p1256_p8 = pneg %p1255_p7 }
 0x40c   : > { %p1261_p12 = pnand %p1260_p11, %p1256_p8 }
 0x40e   : > { %1264 = shalt.err (!%p1261_p12)
}
 0x40f   : > { %s1302_s26 = smov 128   ;;  %s1303_s29 = smov 8  }
 0x410   : > { %1182 = dma.vmem_to_hbm [thread:$0]  (%p1377_p5), %s1547_s28, 1024, %s1545_s10, %s1551_s25, %s1302_s26, %s1302_s26, %s1303_s29  }
 0x411 PF: > { %p1188_p13 = scmp.ge.s32.totalorder %s1299_s24, 2  ;;  %s926_s9 = sand.u32 1, %s1287_s21  }
 0x412   : > { %s927_s11 = scalar_lea.sflag [#allocation3], %s926_s9 }
 0x413   : > { %p1185_p0 = pnand %p1188_p13, %p1381_p6 }
 0x415   : > { %p1186_p1 = pneg %p1185_p0 }
 0x417   : > { %1282 = dma.done.wait (%p1186_p1), %s927_s11, 1024  }
 0x418   : > { %1284 = vsyncadd (%p1186_p1), %s927_s11, 4294966272  ;;  %p16_p2 = scmp.ge.s32.totalorder %s1364_s27, 6   ;;  %s1600_s21 = smov %s1291_s22 }
 0x419   : > { %s1601_s22 = smov %s1295_s23  ;;  %s1602_s23 = smov %s1375_s30 }
 0x41a   : > { %s1603_s24 = smov %s1364_s27  ;;  %18 = sbr.rel (!%p16_p2) target bundleno = 3 (0x3), region = 82 }
 0x41f   :  { %932 = vsyncpa [#allocation3], 1 }
 0x420   :  { %934 = vsyncpa [#allocation3 + $0x1], 1 }

</bundles_post_ra>
